<compile_context>
chip_gen: v6e
topology: v6e:2x2x1
jax: 0.10.0
libtpu: 0.0.40
codegen_flags: <defaults>
</compile_context>

<pallas_src>
import jax
import jax.numpy as jnp
from jax.experimental import pallas as pl
from jax.experimental.pallas import tpu as pltpu  # noqa: F401 (TPU backend)

_LANES = 128  # pad the parameter to a lane-dense (1, 128) tile


def _temperature_kernel(logt_ref, out_ref):
    # torch.clamp(x, min=-18.0)
    x = jnp.maximum(logt_ref[...], jnp.float32(-18.0))
    # F.softplus: jax.nn.softplus == logaddexp(x, 0), numerically stable and
    # equal to PyTorch's threshold-20 softplus within f32 tolerance.
    out_ref[...] = jax.nn.softplus(x) + jnp.float32(1e-8)


def temperature_forward(log_temperature):
    """Pallas equivalent of TemperatureHolder.forward()."""
    log_temperature = jnp.asarray(log_temperature, dtype=jnp.float32)
    orig_shape = log_temperature.shape

    flat = log_temperature.reshape(1, -1)  # (1, N)
    n = flat.shape[1]
    padded_n = max(_LANES, ((n + _LANES - 1) // _LANES) * _LANES)
    x = jnp.pad(flat, ((0, 0), (0, padded_n - n)))  # lane-dense (1, padded_n)

    out = pl.pallas_call(
        _temperature_kernel,
        out_shape=jax.ShapeDtypeStruct(x.shape, jnp.float32),
        in_specs=[pl.BlockSpec(x.shape, lambda: (0, 0))],
        out_specs=pl.BlockSpec(x.shape, lambda: (0, 0)),
        # Same shape/dtype in and out: reuse the input buffer for the output.
        input_output_aliases={0: 0},
    )(x)
    return out[0, :n].reshape(orig_shape)


def temperature_forward_reference(log_temperature):
    """Pure-JAX reference (and the recommended fused-into-XLA form)."""
    x = jnp.maximum(jnp.asarray(log_temperature, jnp.float32), -18.0)
    return jax.nn.softplus(x) + 1e-8


if __name__ == "__main__":
    key = jax.random.PRNGKey(0)

    # Case 1: dim=None -> scalar parameter, deterministic init = 1.0
    log_temp_scalar = jnp.asarray(1.0, dtype=jnp.float32)

    # Case 2: dim=8 -> vector parameter; perturb deterministically around 1.0
    dim = 8
    log_temp_vec = jnp.full((dim,), 1.0, dtype=jnp.float32) + \
        0.1 * jax.random.normal(key, (dim,), dtype=jnp.float32)

    out_scalar = jax.block_until_ready(temperature_forward(log_temp_scalar))
    out_vec = jax.block_until_ready(temperature_forward(log_temp_vec))

    ref_scalar = temperature_forward_reference(log_temp_scalar)
    ref_vec = temperature_forward_reference(log_temp_vec)

    assert out_scalar.shape == log_temp_scalar.shape
    assert out_vec.shape == log_temp_vec.shape
    assert jnp.allclose(out_scalar, ref_scalar, atol=1e-6, rtol=1e-6)
    assert jnp.allclose(out_vec, ref_vec, atol=1e-6, rtol=1e-6)

    print("KERNEL_OK")
</pallas_src>

<mosaic_0001>
module attributes {stable_mosaic.version = 11 : i64} {
  func.func @_temperature_kernel(%arg0: memref<1x128xf32, #tpu.memory_space<vmem>>, %arg1: memref<1x128xf32, #tpu.memory_space<vmem>>) attributes {dimension_semantics = [], scalar_prefetch = 0 : i64, scratch_operands = 0 : i64, tpu.core_type = #tpu.core_type<tc>} {
    %c0 = arith.constant 0 : index
    %c0_0 = arith.constant 0 : index
    %0 = vector.load %arg0[%c0, %c0_0] : memref<1x128xf32, #tpu.memory_space<vmem>>, vector<1x128xf32>
    %cst = arith.constant -1.800000e+01 : f32
    %1 = vector.broadcast %cst : f32 to vector<1x128xf32>
    %2 = arith.maximumf %0, %1 : vector<1x128xf32>
    %cst_1 = arith.constant 0.000000e+00 : f32
    %3 = vector.broadcast %cst_1 : f32 to vector<1x128xf32>
    %4 = arith.maximumf %2, %3 : vector<1x128xf32>
    %5 = vector.broadcast %cst_1 : f32 to vector<1x128xf32>
    %6 = arith.subf %2, %5 : vector<1x128xf32>
    %7 = arith.cmpf one, %6, %6 : vector<1x128xf32>
    %8 = vector.broadcast %cst_1 : f32 to vector<1x128xf32>
    %9 = arith.addf %2, %8 : vector<1x128xf32>
    %10 = math.absf %6 : vector<1x128xf32>
    %cst_2 = arith.constant 0.000000e+00 : f32
    %11 = vector.broadcast %cst_2 : f32 to vector<1x128xf32>
    %12 = arith.subf %11, %10 : vector<1x128xf32>
    %13 = math.exp %12 : vector<1x128xf32>
    %14 = math.log1p %13 : vector<1x128xf32>
    %15 = arith.addf %4, %14 : vector<1x128xf32>
    %16 = arith.select %7, %9, %15 : vector<1x128xi1>, vector<1x128xf32>
    %cst_3 = arith.constant 9.99999993E-9 : f32
    %17 = vector.broadcast %cst_3 : f32 to vector<1x128xf32>
    %18 = arith.addf %16, %17 : vector<1x128xf32>
    %c0_4 = arith.constant 0 : index
    %c0_5 = arith.constant 0 : index
    %19 = vector.load %arg1[%c0_4, %c0_5] : memref<1x128xf32, #tpu.memory_space<vmem>>, vector<1x128xf32>
    tpu.vector_store %arg1[%c0_4, %c0_5], %18 {strides = array<i32>} : memref<1x128xf32, #tpu.memory_space<vmem>>, vector<1x128xf32>,
    return
  }
}

</mosaic_0001>

<bundles_post_ra>
// kernel: tpu_custom_call.1
= control target key start
LH: loop header
LB: loop body
LE: loop exit
PB: predicated region body
PF: predicated region fallthrough
CT: control target
= control target key end

     0   :  { %6 = vsyncpa [#allocation3], 0  ;;  %s126_s0 = inlined_call_operand.hbm [shape: f32[1,128], index: 0, kind: input, shape index: {}, may-alias: {0,1}]   ;;  %s127_s1 = inlined_call_operand.hbm [shape: f32[1,128], index: 1, kind: output, shape index: {}, may-alias: {0,1}]  }
   0x1   :  { %7 = vsyncpa [#allocation4], 0  ;;  %s108_s6 = smov [#allocation2]  }
   0x2   :  { %s14_s7 = sshll.u32 %s108_s6, 4  ;;  %s15_s7 = int_to_ptr.vmem [resolvable:$true] %s14_s7 }
   0x3   :  { %s72_s8 = scalar_lea.vmem %s15_s7, 16  ;;  %s76_s9 = scalar_lea.vmem %s15_s7, 32 }
   0x4   :  { %p73_p0 = scmp.ne.s32.totalorder %s15_s7, %s72_s8  ;;  %p77_p1 = scmp.lt.s32.totalorder %s15_s7, %s15_s7 }
   0x5   :  { %p78_p2 = scmp.lt.s32.totalorder %s76_s9, %s72_s8 }
   0x7   :  { %p79_p3 = por %p78_p2, %p77_p1 }
   0x9   :  { %p80_p4 = pnand %p79_p3, %p73_p0 }
   0xb   :  { %83 = shalt.err (!%p80_p4)
}
   0xc   :  { %17 = dma.hbm_to_vmem [thread:$0]  %s126_s0, 16, %s15_s7, [#allocation3]  }
   0xd   :  { %104 = dma.done.wait [#allocation3], 16  }
   0xe   :  { %105 = vsyncadd [#allocation3], 4294967280  ;;  %v21_v0 = vld [vmem:[#allocation2] sm:$0x1]  ;;  %s109_s0 = smov [#allocation5]  }
   0xf   :  { %v22_v1 = vmax.f32 %v21_v0, -18.0  ;;  %s49_s12 = sshll.u32 %s109_s0, 4  ;;  %s50_s12 = int_to_ptr.vmem [resolvable:$true] %s49_s12 }
  0x10   :  { %s84_s13 = scalar_lea.vmem %s50_s12, 16  ;;  %s88_s14 = scalar_lea.vmem %s50_s12, 32 }
  0x11   :  { %v26_v2 = vand.u32 2147483647, %v22_v1  ;;  %v23_v12 = vmax.f32 %v22_v1, 0.0  ;;  %vm24_vm1 = vcmp.ne.f32.partialorder %v22_v1, %v22_v1  ;;  %p85_p5 = scmp.ne.s32.totalorder %s50_s12, %s84_s13  ;;  %p89_p6 = scmp.lt.s32.totalorder %s50_s12, %s50_s12 }
  0x12   :  { %p90_p7 = scmp.lt.s32.totalorder %s88_s14, %s84_s13 }
  0x13   :  { %v27_v3 = vsub.f32 0.0, %v26_v2 }
  0x14   :  { %p91_p8 = por %p90_p7, %p89_p6 }
  0x15   :  { %v28_v4 = vmul.f32 1.442695, %v27_v3 }
  0x16   :  { %p92_p9 = pnand %p91_p8, %p85_p5 }
  0x17   :  { %60 = vpow2.f32 %v28_v4 }
  0x24   :  { %v61_v5 = vpop.eup %60 }
  0x25   :  { %v30_v6 = vadd.f32 1.0, %v61_v5  ;;  %v33_v7 = vmul.f32 -0.5, %v61_v5  ;;  %v36_v9 = vand.u32 2147483647, %v61_v5 }
  0x27   :  { %62 = vlog2.f32 %v30_v6  ;;  %v34_v8 = vadd.f32 1.0, %v33_v7  ;;  %vm37_vm0 = vcmp.lt.f32.partialorder %v36_v9, 0.0004427343 }
  0x29   :  { %v35_v10 = vmul.f32 %v61_v5, %v34_v8 }
  0x34   :  { %v63_v11 = vpop.eup %62 }
  0x35   :  { %v32_v13 = vmul.f32 0.6931472, %v63_v11 }
  0x37   :  { %v38_v14 = vsel %vm37_vm0, %v35_v10, %v32_v13 }
  0x38   :  { %v39_v15 = vadd.f32 %v38_v14, %v23_v12 }
  0x3a   :  { %v40_v16 = vsel %vm24_vm1, %v22_v1, %v39_v15 }
  0x3b   :  { %v41_v17 = vadd.f32 1e-08, %v40_v16 }
  0x3d   :  { %42 = vst [vmem:[#allocation5] sm:$0x1] %v41_v17 }
  0x3e   :  { %95 = shalt.err (!%p92_p9)
}
  0x3f   :  { %52 = dma.vmem_to_hbm [thread:$0]  %s50_s12, 16, %s127_s1, [#allocation4]  }
  0x40   :  { %106 = dma.done.wait [#allocation4], 16  }
  0x41   :  { %107 = vsyncadd [#allocation4], 4294967280 }
  0x42   :  { %56 = vsyncpa [#allocation3], 1 }
  0x43   :  { %57 = vsyncpa [#allocation4], 1 }

</bundles_post_ra>
